<compile_context>
chip_gen: v6e
topology: v6e:2x2x1
jax: 0.10.0
libtpu: 0.0.40
codegen_flags: <defaults>
</compile_context>

<pallas_src>
import jax
import jax.numpy as jnp
from jax.experimental import pallas as pl
from jax.experimental.pallas import tpu as pltpu


def _round_up(x, m):
    return (x + m - 1) // m * m


def _vmem_capacity_bytes():
    try:
        return int(pltpu.get_tpu_info().vmem_capacity_bytes)
    except Exception:
        return 64 * 1024 * 1024  # conservative (v7x-sized) fallback


def _make_kernel(*, use_smooth, confidence, smooth_scale, ce,
                 n_valid, block_n, needs_mask):
    """Builds the tile kernel. Signature depends on whether per_cls_smooth
    is streamed (so the unused (N, C) array is never DMA'd)."""

    def kernel(*refs):
        if use_smooth:
            y_ref, tgt_ref, sm_ref, out_ref = refs
        else:
            y_ref, tgt_ref, out_ref = refs

        logits = y_ref[...].astype(jnp.float32)                    # (TN, C)

        if needs_mask:
            row_ids = (pl.program_id(0) * block_n
                       + jax.lax.broadcasted_iota(jnp.int32, (block_n, 1), 0))
            valid = row_ids < n_valid                              # (TN, 1)
            # The last tile's out-of-bounds rows hold unspecified bits; select
            # them out BEFORE max/exp so NaN/Inf garbage cannot propagate.
            logits = jnp.where(valid, logits, 0.0)

        # Stable log-softmax pieces along the class (lane) axis.
        m = jnp.max(logits, axis=-1, keepdims=True)
        shifted = logits - m                                        # (TN, C)
        lse = jnp.log(jnp.sum(jnp.exp(shifted), axis=-1, keepdims=True))  # (TN,1)

        # One-hot target pick via lane-index compare (no dynamic gather).
        col_ids = jax.lax.broadcasted_iota(jnp.int32, shifted.shape, 1)
        is_tgt = col_ids == tgt_ref[...]                            # (TN, C)
        tgt_shift = jnp.sum(jnp.where(is_tgt, shifted, 0.0),
                            axis=-1, keepdims=True)                 # (TN, 1)

        # Algebraic fusion: -sum(w * (shifted - lse)) = lse*sum(w) - sum(w*shifted)
        #   ce:      w = onehot                              -> sum(w) = 1
        #   tunable: w = conf*onehot + (tsc/C)*sm            -> sum(w) = conf + (tsc/C)*sum(sm)
        #   uniform: w = conf*onehot + 1/C                   -> sum(w) = conf + 1
        if ce:
            loss_row = lse - tgt_shift
        elif use_smooth:
            sm = sm_ref[...].astype(jnp.float32)
            sm_shift = jnp.sum(sm * shifted, axis=-1, keepdims=True)
            sm_sum = jnp.sum(sm, axis=-1, keepdims=True)
            loss_row = (lse * (confidence + smooth_scale * sm_sum)
                        - confidence * tgt_shift - smooth_scale * sm_shift)
        else:  # uniform smoothing
            shift_sum = jnp.sum(shifted, axis=-1, keepdims=True)
            loss_row = (lse * (confidence + 1.0)
                        - confidence * tgt_shift - smooth_scale * shift_sum)

        if needs_mask:
            loss_row = jnp.where(valid, loss_row, 0.0)

        # Two-level sum: class axis per row above, rows per tile here,
        # tiles summed in the wrapper (keeps summation-order drift small).
        partial = jnp.sum(loss_row)
        out_ref[...] = jnp.broadcast_to(partial, out_ref.shape).astype(out_ref.dtype)

    return kernel


def tunable_label_smoothing_ce(y_pred, target, per_cls_smooth, *,
                               total_smooth_capacity=0.1,
                               uniform_smooth=False,
                               ce=False,
                               block_n=None,
                               smooth_stream_dtype=jnp.bfloat16):
    assert per_cls_smooth.shape == y_pred.shape, \
        "smoothing values should match each cell in y_pred"
    N, C = y_pred.shape
    confidence = 1.0 - float(total_smooth_capacity)
    use_smooth = (not uniform_smooth) and (not ce)

    # per_cls_smooth is probability-like; stream it in bf16 (upcast to f32
    # inside the kernel) to cut HBM bytes on a memory-bound op. Ideally it is
    # produced in bf16 upstream so this cast is a no-op.
    if use_smooth and smooth_stream_dtype is not None:
        per_cls_smooth = per_cls_smooth.astype(smooth_stream_dtype)

    y_item = jnp.dtype(y_pred.dtype).itemsize
    sm_item = jnp.dtype(per_cls_smooth.dtype).itemsize if use_smooth else 0

    vmem_cap = _vmem_capacity_bytes()
    if block_n is None:
        # Per-row cost: 2x double-buffered input streams + ~4 live (TN, C) f32
        # temporaries inside the body; fit within ~25% of VMEM and also cap
        # the largest per-buffer DMA at ~4 MiB (HBM is saturated well before
        # that; larger tiles only add spill/prologue cost, esp. on v7x).
        stream_row = C * (y_item + sm_item) + 4
        temp_row = 4 * C * 4
        vmem_block = int(vmem_cap * 0.25) // max(2 * stream_row + temp_row, 1)
        dma_block = (4 << 20) // max(C * y_item, 1)
        block_n = min(1024, vmem_block, dma_block)
    block_n = max(8, (int(block_n) // 8) * 8)
    # Split into >= 2 (aim ~8) tiles when the batch allows it: shards the
    # "parallel" grid axis across both v7x TensorCores and shortens the
    # pipeline tail. Harmless on single-TC v5e/v6e.
    block_n = min(block_n, max(8, _round_up(pl.cdiv(N, 8), 8)))
    block_n = min(block_n, _round_up(N, 8))

    num_tiles = pl.cdiv(N, block_n)
    needs_mask = num_tiles * block_n != N   # last tile reads OOB rows (no jnp.pad)

    tgt2d = target.astype(jnp.int32).reshape(N, 1)
    smooth_scale = (float(total_smooth_capacity) / C) if use_smooth else (1.0 / C)

    kernel = _make_kernel(
        use_smooth=use_smooth,
        confidence=confidence,
        smooth_scale=smooth_scale,
        ce=bool(ce),
        n_valid=N,
        block_n=block_n,
        needs_mask=needs_mask,
    )

    # Deeper buffering only pays when per-step DMAs are small.
    y_block_bytes = block_n * C * y_item
    deep = (y_block_bytes < (1 << 20)) and (num_tiles >= 4)
    stream_kwargs = dict(pipeline_mode=pl.Buffered(3)) if deep else {}

    in_specs = [
        pl.BlockSpec((block_n, C), lambda i: (i, 0), **stream_kwargs),   # y_pred
        pl.BlockSpec((block_n, 1), lambda i: (i, 0)),                    # targets
    ]
    inputs = [y_pred, tgt2d]
    if use_smooth:
        in_specs.append(
            pl.BlockSpec((block_n, C), lambda i: (i, 0), **stream_kwargs))
        inputs.append(per_cls_smooth)

    # Scoped VMEM limit: buffered input tiles + in-kernel f32 temps + headroom.
    n_bufs = 3 if deep else 2
    tile_bytes = (n_bufs * block_n * (C * (y_item + sm_item) + 4)
                  + 4 * block_n * C * 4
                  + 2 * 8 * 128 * 4)
    vmem_limit = min(int(vmem_cap * 0.9), max(32 << 20, tile_bytes + (4 << 20)))

    cost = pl.CostEstimate(
        flops=6 * N * C,
        transcendentals=N * C + N,
        bytes_accessed=N * C * (y_item + sm_item) + N * 4 + num_tiles * 8 * 128 * 4,
    )

    out = pl.pallas_call(
        kernel,
        out_shape=jax.ShapeDtypeStruct((num_tiles, 8, 128), jnp.float32),
        grid_spec=pltpu.PrefetchScalarGridSpec(
            num_scalar_prefetch=0,
            grid=(num_tiles,),
            in_specs=in_specs,
            out_specs=pl.BlockSpec((1, 8, 128), lambda i: (i, 0, 0)),
        ),
        compiler_params=pltpu.CompilerParams(
            dimension_semantics=("parallel",),
            vmem_limit_bytes=int(vmem_limit),
        ),
        cost_estimate=cost,
    )(*inputs)

    # Tiny final reduction over per-tile partial sums, then the mean over N.
    return jnp.sum(out[:, 0, 0]) / jnp.float32(N)


def _reference(y_pred, target, per_cls_smooth, *,
               total_smooth_capacity=0.1, uniform_smooth=False, ce=False):
    confidence = 1.0 - total_smooth_capacity
    sm = per_cls_smooth * total_smooth_capacity
    logprobs = jax.nn.log_softmax(y_pred, axis=-1)
    nll = -jnp.take_along_axis(logprobs, target[:, None], axis=-1)[:, 0]
    if uniform_smooth:
        smooth = -jnp.mean(logprobs, axis=-1)
    else:
        smooth = -jnp.mean(sm * logprobs, axis=-1)
    loss = confidence * nll + smooth
    if ce:
        loss = nll
    return jnp.mean(loss)


if __name__ == "__main__":
    key = jax.random.PRNGKey(0)
    k1, k2, k3 = jax.random.split(key, 3)

    N, C = 16, 32                      # batch=16 samples, 32 classes
    y_pred = jax.random.normal(k1, (N, C), dtype=jnp.float32)
    target = jax.random.randint(k2, (N,), 0, C, dtype=jnp.int32)
    per_cls_smooth = jax.nn.softmax(
        jax.random.normal(k3, (N, C), dtype=jnp.float32), axis=-1)
    # Kernel streams the smoothing tensor in bf16; compare against a reference
    # that sees the same rounding.
    sm_q = per_cls_smooth.astype(jnp.bfloat16).astype(jnp.float32)

    configs = [
        dict(total_smooth_capacity=0.1, uniform_smooth=False, ce=False),
        dict(total_smooth_capacity=0.1, uniform_smooth=True, ce=False),
        dict(total_smooth_capacity=0.1, uniform_smooth=False, ce=True),
    ]
    for cfg in configs:
        out = tunable_label_smoothing_ce(y_pred, target, per_cls_smooth, **cfg)
        out = jax.block_until_ready(out)
        ref = _reference(y_pred, target, sm_q, **cfg)
        assert jnp.allclose(out, ref, atol=1e-4, rtol=1e-4), (cfg, out, ref)

    # Ragged batch size (exercises the unpadded OOB-row masking path).
    Nr = 13
    out = tunable_label_smoothing_ce(y_pred[:Nr], target[:Nr],
                                     per_cls_smooth[:Nr])
    out = jax.block_until_ready(out)
    ref = _reference(y_pred[:Nr], target[:Nr], sm_q[:Nr])
    assert jnp.allclose(out, ref, atol=1e-4, rtol=1e-4), (out, ref)

    # bf16 logits path (in-kernel f32 upcast).
    out = tunable_label_smoothing_ce(y_pred.astype(jnp.bfloat16), target,
                                     per_cls_smooth)
    out = jax.block_until_ready(out)
    ref = _reference(y_pred.astype(jnp.bfloat16).astype(jnp.float32),
                     target, sm_q)
    assert jnp.allclose(out, ref, atol=1e-3, rtol=1e-3), (out, ref)

    print("KERNEL_OK")
</pallas_src>

<mosaic_0001>
module attributes {stable_mosaic.version = 11 : i64} {
  func.func @kernel(%arg0: i32, %arg1: memref<8x32xf32, #tpu.memory_space<vmem>>, %arg2: memref<8x1xi32, #tpu.memory_space<vmem>>, %arg3: memref<8x32xbf16, #tpu.memory_space<vmem>>, %arg4: memref<1x8x128xf32, #tpu.memory_space<vmem>>) attributes {dimension_semantics = [#tpu.dimension_semantics<parallel>], iteration_bounds = array<i64: 2>, scalar_prefetch = 0 : i64, scratch_operands = 0 : i64, tpu.core_type = #tpu.core_type<tc>, window_params = [{transform_indices = @transform_0, window_bounds = array<i64: 8, 32>}, {transform_indices = @transform_1, window_bounds = array<i64: 8, 1>}, {transform_indices = @transform_2, window_bounds = array<i64: 8, 32>}, {transform_indices = @transform_3, window_bounds = array<i64: 1, 8, 128>}]} {
    %c0 = arith.constant 0 : index
    %c0_0 = arith.constant 0 : index
    %0 = vector.load %arg1[%c0, %c0_0] : memref<8x32xf32, #tpu.memory_space<vmem>>, vector<8x32xf32>
    %cst = arith.constant dense<0xFF800000> : vector<8xf32>
    %1 = vector.multi_reduction <maximumf>, %0, %cst [1] : vector<8x32xf32> to vector<8xf32>
    %2 = vector.shape_cast %1 : vector<8xf32> to vector<8x1xf32>
    %3 = vector.broadcast %2 : vector<8x1xf32> to vector<8x32xf32>
    %4 = arith.subf %0, %3 : vector<8x32xf32>
    %5 = math.exp %4 : vector<8x32xf32>
    %cst_1 = arith.constant dense<0.000000e+00> : vector<8xf32>
    %6 = vector.multi_reduction <add>, %5, %cst_1 [1] : vector<8x32xf32> to vector<8xf32>
    %7 = vector.shape_cast %6 : vector<8xf32> to vector<8x1xf32>
    %8 = math.log %7 : vector<8x1xf32>
    %9 = tpu.iota {dimensions = array<i32: 1>} : vector<8x32xi32>
    %c0_2 = arith.constant 0 : index
    %c0_3 = arith.constant 0 : index
    %10 = vector.load %arg2[%c0_2, %c0_3] : memref<8x1xi32, #tpu.memory_space<vmem>>, vector<8x1xi32>
    %11 = vector.broadcast %10 : vector<8x1xi32> to vector<8x32xi32>
    %12 = arith.cmpi eq, %9, %11 : vector<8x32xi32>
    %cst_4 = arith.constant 0.000000e+00 : f32
    %13 = vector.broadcast %cst_4 : f32 to vector<8x32xf32>
    %14 = arith.select %12, %4, %13 : vector<8x32xi1>, vector<8x32xf32>
    %cst_5 = arith.constant dense<0.000000e+00> : vector<8xf32>
    %15 = vector.multi_reduction <add>, %14, %cst_5 [1] : vector<8x32xf32> to vector<8xf32>
    %16 = vector.shape_cast %15 : vector<8xf32> to vector<8x1xf32>
    %c0_6 = arith.constant 0 : index
    %c0_7 = arith.constant 0 : index
    %17 = vector.load %arg3[%c0_6, %c0_7] : memref<8x32xbf16, #tpu.memory_space<vmem>>, vector<8x32xbf16>
    %18 = arith.extf %17 : vector<8x32xbf16> to vector<8x32xf32>
    %19 = arith.mulf %18, %4 : vector<8x32xf32>
    %cst_8 = arith.constant dense<0.000000e+00> : vector<8xf32>
    %20 = vector.multi_reduction <add>, %19, %cst_8 [1] : vector<8x32xf32> to vector<8xf32>
    %21 = vector.shape_cast %20 : vector<8xf32> to vector<8x1xf32>
    %cst_9 = arith.constant dense<0.000000e+00> : vector<8xf32>
    %22 = vector.multi_reduction <add>, %18, %cst_9 [1] : vector<8x32xf32> to vector<8xf32>
    %23 = vector.shape_cast %22 : vector<8xf32> to vector<8x1xf32>
    %cst_10 = arith.constant 3.125000e-03 : f32
    %24 = vector.broadcast %cst_10 : f32 to vector<8x1xf32>
    %25 = arith.mulf %24, %23 : vector<8x1xf32>
    %cst_11 = arith.constant 0.899999976 : f32
    %26 = vector.broadcast %cst_11 : f32 to vector<8x1xf32>
    %27 = arith.addf %26, %25 : vector<8x1xf32>
    %28 = arith.mulf %8, %27 : vector<8x1xf32>
    %cst_12 = arith.constant 0.899999976 : f32
    %29 = vector.broadcast %cst_12 : f32 to vector<8x1xf32>
    %30 = arith.mulf %29, %16 : vector<8x1xf32>
    %31 = arith.subf %28, %30 : vector<8x1xf32>
    %cst_13 = arith.constant 3.125000e-03 : f32
    %32 = vector.broadcast %cst_13 : f32 to vector<8x1xf32>
    %33 = arith.mulf %32, %21 : vector<8x1xf32>
    %34 = arith.subf %31, %33 : vector<8x1xf32>
    %35 = vector.shape_cast %34 : vector<8x1xf32> to vector<1x8x1xf32>
    %cst_14 = arith.constant dense<0.000000e+00> : vector<1xf32>
    %36 = vector.multi_reduction <add>, %35, %cst_14 [1, 2] : vector<1x8x1xf32> to vector<1xf32>
    %37 = vector.shape_cast %36 : vector<1xf32> to vector<1x1x1xf32>
    %38 = vector.extract %37[0, 0, 0] : f32 from vector<1x1x1xf32>
    %39 = vector.broadcast %38 : f32 to vector<1x8x128xf32>
    %c0_15 = arith.constant 0 : index
    %c0_16 = arith.constant 0 : index
    %c0_17 = arith.constant 0 : index
    %40 = vector.load %arg4[%c0_15, %c0_16, %c0_17] : memref<1x8x128xf32, #tpu.memory_space<vmem>>, vector<1x8x128xf32>
    tpu.vector_store %arg4[%c0_15, %c0_16, %c0_17], %39 {strides = array<i32>} : memref<1x8x128xf32, #tpu.memory_space<vmem>>, vector<1x8x128xf32>,
    return
  }
  func.func @transform_0(%arg0: i32) -> (i32, i32) {
    %c0_i32 = arith.constant 0 : i32
    %c0_i32_0 = arith.constant 0 : i32
    return %arg0, %c0_i32 : i32, i32
  }
  func.func @transform_1(%arg0: i32) -> (i32, i32) {
    %c0_i32 = arith.constant 0 : i32
    %c0_i32_0 = arith.constant 0 : i32
    return %arg0, %c0_i32 : i32, i32
  }
  func.func @transform_2(%arg0: i32) -> (i32, i32) {
    %c0_i32 = arith.constant 0 : i32
    %c0_i32_0 = arith.constant 0 : i32
    return %arg0, %c0_i32 : i32, i32
  }
  func.func @transform_3(%arg0: i32) -> (i32, i32, i32) {
    %c0_i32 = arith.constant 0 : i32
    %c0_i32_0 = arith.constant 0 : i32
    %c0_i32_1 = arith.constant 0 : i32
    return %arg0, %c0_i32, %c0_i32_0 : i32, i32, i32
  }
}

</mosaic_0001>

<bundles_post_ra>
// kernel: tpu_custom_call.1
= control target key start
LH: loop header
LB: loop body
LE: loop exit
PB: predicated region body
PF: predicated region fallthrough
CT: control target
= control target key end

     0   :  { %8 = vsyncpa [#allocation3], 0  ;;  %s727_s0 = inlined_call_operand.vmem [shape: f32[16,32], index: 0, kind: input, shape index: {}]   ;;  %s728_s1 = inlined_call_operand.vmem [shape: s32[16,1], index: 1, kind: input, shape index: {}]   ;;  %s729_s2 = inlined_call_operand.hbm [shape: bf16[16,32], index: 2, kind: input, shape index: {}]   ;;  %s730_s3 = inlined_call_operand.hbm [shape: f32[2,8,128], index: 3, kind: output, shape index: {}]  }
   0x1   :  { %10 = vsyncpa [#allocation3 + $0x1], 0 }
   0x2   :  { %11 = vsyncpa [#allocation4], 0 }
   0x3   :  { %13 = vsyncpa [#allocation4 + $0x1], 0  ;;  %s566_s12 = smov 0   ;;  %s568_s13 = smov 0  }
   0x4   :  { %s570_s14 = smov 0   ;;  %s572_s15 = smov 0  }
   0x5 LB: > { %s587_s16 = sadd.s32 4294967295, %s541_s15   ;;  %s381_s17 = sadd.s32 4294967294, %s541_s15   ;;  %s541_s15 = sphi %s572_s15, %s747_s15   ;;  %s537_s14 = sphi %s570_s14, %s746_s14   ;;  %s533_s13 = sphi %s568_s13, %s745_s13   ;;  %s529_s12 = sphi %s566_s12, %s744_s12  }
   0x6   : > { %s591_s18 = sadd.s32 1, %s541_s15   ;;  %s78_s19 = sadd.s32 1, %s537_s14 }
   0x7   : > { %s75_s20 = ssub.s32 %s541_s15, %s591_s18  ;;  %p85_p0 = scmp.ne.s32.totalorder %s537_s14, %s533_s13 }
   0x8   : > { %p76_p1 = scmp.eq.s32.totalorder %s75_s20, 0  ;;  %p86_p2 = scmp.eq.s32.totalorder %s541_s15, 0 }
   0x9   : > { %p91_p3 = scmp.ne.s32.totalorder %s533_s13, %s529_s12  ;;  %p92_p4 = scmp.eq.s32.totalorder %s587_s16, 0 }
   0xa   : > { %s603_s21 = scalar_select %p76_p1, %s537_s14, %s78_s19  }
   0xb   : > { %p605_p5 = por %p86_p2, %p85_p0  ;;  %p609_p6 = por %p92_p4, %p91_p3 }
   0xc   : > { %p115_p7 = scmp.eq.s32.totalorder %s587_s16, 1  ;;  %p121_p8 = scmp.eq.s32.totalorder %s381_s17, 1 }
   0xd   : > { %s734_s23 = scalar_select %p609_p6, 1, 0 }
   0xe   : > { %p409_p10 = scmp.lt.s32.totalorder %s541_s15, 2  ;;  %p616_p11 = por %p115_p7, %p85_p0 }
   0xf   : > { %p620_p12 = por %p121_p8, %p91_p3  ;;  %s155_s26 = sand.u32 1, %s537_s14  }
  0x10   : > { %s735_s24 = scalar_select %p616_p11, 1, 0 }
  0x11   : > { %s736_s25 = scalar_select %p620_p12, 1, 0 }
  0x12   : > { %s385_s27 = sshll.u32 %s541_s15, 6  ;;  %s384_s28 = sshll.u32 %s155_s26, 2 }
  0x13   : > { %s629_s4 = scalar_lea.hbm %s729_s2, %s385_s27  ;;  %s159_s5 = scalar_lea.vmem [#allocation2], %s384_s28 }
  0x14   : > { %s166_s6 = sshll.u32 %s159_s5, 4  ;;  %p633_p13 = pnand %p409_p10, %p605_p5  ;;  %s637_s6 = int_to_ptr.vmem [resolvable:$true] %s166_s6 }
  0x15   : > { %s156_s8 = scalar_lea.sflag [#allocation3], %s155_s26  ;;  %s449_s9 = scalar_lea.hbm %s629_s4, 64 }
  0x16   : > { %p450_p2 = scmp.ne.s32.totalorder %s629_s4, %s449_s9  ;;  %p451_p3 = pneg %p633_p13 }
  0x17   : > { %s454_s17 = scalar_lea.hbm %s729_s2, 128  ;;  %p455_p5 = scmp.lt.s32.totalorder %s629_s4, %s729_s2 }
  0x18   : > { %p452_p4 = pnand %p451_p3, %p450_p2  ;;  %p456_p8 = scmp.lt.s32.totalorder %s454_s17, %s449_s9 }
  0x1a   : > { %p453_p7 = pneg %p452_p4  ;;  %p457_p10 = por %p456_p8, %p455_p5 }
  0x1c   : > { %p458_p9 = pnand %p457_p10, %p453_p7 }
  0x1e   : > { %461 = shalt.err (!%p458_p9)
}
  0x1f   : > { %s462_s22 = scalar_lea.vmem %s637_s6, 64  ;;  %s543_s26 = smov [#allocation2]  }
  0x20   : > { %p463_p0 = scmp.ne.s32.totalorder %s637_s6, %s462_s22  ;;  %s467_s27 = sshll.u32 %s543_s26, 4  ;;  %s468_s27 = int_to_ptr.vmem [resolvable:$false] %s467_s27 }
  0x21   : > { %s469_s28 = scalar_lea.vmem %s468_s27, 128  ;;  %p470_p4 = scmp.lt.s32.totalorder %s637_s6, %s468_s27 }
  0x22   : > { %p465_p1 = pnand %p463_p0, %p451_p3  ;;  %p471_p12 = scmp.lt.s32.totalorder %s469_s28, %s462_s22 }
  0x24   : > { %p466_p2 = pneg %p465_p1  ;;  %p472_p11 = por %p471_p12, %p470_p4 }
  0x26   : > { %p473_p6 = pnand %p472_p11, %p466_p2 }
  0x28   : > { %476 = shalt.err (!%p473_p6)
}
  0x29   : > { %404 = dma.hbm_to_vmem [thread:$0]  (!%p633_p13), %s629_s4, 64, %s637_s6, %s156_s8  }
  0x2a   : > { %p738_p9 = scmp.lt.s32.totalorder %s541_s15, 3  ;;  %p739_p7 = scmp.ge.s32.totalorder %s541_s15, 1 }
  0x2c   : > { %p172_p0 = pnand %p739_p7, %p738_p9 }
  0x2d   : > { %s664_s29 = sand.u32 (!%p172_p0), 1, %s533_s13   ;;  %p740_p6 = scmp.ne.s32.totalorder (!%p172_p0), %s734_s23, 0 }
  0x2e   : > { %175 = sbr.rel (%p172_p0) target bundleno = 592 (0x250), region = 32  ;;  %s387_s30 = sshll.u32 (!%p172_p0), %s664_s29, 2 }
  0x2f   : > { %s178_s5 = scalar_lea.sflag (!%p172_p0), [#allocation3], %s664_s29  ;;  %s181_s9 = scalar_lea.vmem (!%p172_p0), [#allocation2], %s387_s30 }
  0x33   : > { %520 = dma.done.wait (%p740_p6), %s178_s5, 64  }
  0x34   : > { %522 = vsyncadd (%p740_p6), %s178_s5, 4294967232  ;;  %p212_p11 = scmp.lt.s32.totalorder %s587_s16, 1  ;;  %v544_v0 = vmov 0   ;;  %vm221_vm0 = vcmask 261120   ;;  %v233_v7 = vlaneseq  ;;  %v244_v8 = vld [vmem:[%s181_s9] sm:$0xf] }
  0x35   : > { %444 = vset.pattern.permute.xlu0 %v544_v0  ;;  %v245_v13 = vunpack.c.l.bf16 %v244_v8  ;;  %vm260_vm2 = vcmask 7168   ;;  %s388_s19 = sshll.u32 %s664_s29, 3  ;;  %s392_s26 = sshll.u32 %s587_s16, 7 }
  0x36   : > { %s213_s4 = scalar_select %p212_p11, %s587_s16, 1  ;;  %v234_v9 = vand.u32 127, %v233_v7 }
  0x37   : > { %v250_v14 = vsel %vm221_vm0, %v245_v13, 0.0  ;;  %s211_s20 = scalar_lea.vmem [#allocation5], %s388_s19  ;;  %s285_s5 = scalar_lea.hbm %s730_s3, %s392_s26 }
  0x38   : > { %s389_s6 = sshll.u32 %s213_s4, 3  ;;  %s287_s22 = sshll.u32 %s211_s20, 4  ;;  %s687_s22 = int_to_ptr.vmem [resolvable:$true] %s287_s22 }
  0x39   : > { %s215_s10 = scalar_lea.vmem %s727_s0, %s389_s6  ;;  %s219_s23 = scalar_lea.vmem %s728_s1, %s389_s6 }
  0x3a   : > { %v220_v1 = vld [vmem:[%s215_s10] sm:$0xff]  ;;  %s274_s9 = scalar_lea.sflag [#allocation4], %s664_s29  ;;  %s477_s4 = scalar_lea.vmem %s687_s22, 128 }
  0x3b   : > { %v222_v2 = vsel %vm221_vm0, %v220_v1, -inf  ;;  %v235_v3 = vld [vmem:[%s219_s23] sm:$0xff]  ;;  %p478_p12 = scmp.ne.s32.totalorder %s687_s22, %s477_s4  ;;  %p741_p13 = scmp.ne.s32.totalorder %s735_s24, 0 }
  0x3c   : > { %223 = vmax.xlane.f32.xlu0 %v222_v2  ;;  %s545_s6 = smov [#allocation5]  }
  0x3d   : > { %p479_p1 = pnand %p478_p12, %p741_p13  ;;  %s481_s16 = sshll.u32 %s545_s6, 4  ;;  %s482_s16 = int_to_ptr.vmem [resolvable:$false] %s481_s16 }
  0x3e   : > { %s483_s7 = scalar_lea.vmem %s482_s16, 256  ;;  %p484_p5 = scmp.lt.s32.totalorder %s687_s22, %s482_s16 }
  0x3f   : > { %p480_p3 = pneg %p479_p1  ;;  %p485_p8 = scmp.lt.s32.totalorder %s483_s7, %s477_s4 }
  0x41   : > { %p486_p10 = por %p485_p8, %p484_p5 }
  0x43   : > { %p487_p2 = pnand %p486_p10, %p480_p3 }
  0x52   : > { %237 = vperm.xlu0 %444, %v235_v3  }
  0xc5   : > { %v224_v4 = vpop.xlane.xlu0 %223 }
  0xc6   : > { %v225_v5 = vsub.f32 %v220_v1, %v224_v4 }
  0xc8   : > { %v226_v6 = vmul.f32 1.442695, %v225_v5  ;;  %v246_v17 = vmul.f32 %v245_v13, %v225_v5 }
  0xca   : > { %445 = vpow2.f32 %v226_v6  ;;  %v247_v18 = vsel %vm221_vm0, %v246_v17, 0.0 }
  0xcd   : > { %v238_v11 = vpop.permute.xlu0 %237 }
  0xce   : > { %vm239_vm1 = vcmp.eq.s32.totalorder %v234_v9, %v238_v11 }
  0xcf   : > { %v240_v15 = vsel %vm239_vm1, %v225_v5, 0.0 }
  0xd0   : > { %v241_v16 = vsel %vm221_vm0, %v240_v15, 0.0 }
  0xd7   : > { %v446_v10 = vpop.eup %445 }
  0xd8   : > { %v228_v12 = vsel %vm221_vm0, %v446_v10, 0.0 }
  0xd9   : > { %229 = vadd.xlane.f32.xlu1 %v228_v12 }
  0xdd   : > { %251 = vadd.xlane.f32.xlu1 %v250_v14 }
  0xe1   : > { %242 = vadd.xlane.f32.xlu1 %v241_v16 }
  0xe5   : > { %248 = vadd.xlane.f32.xlu1 %v247_v18 }
 0x162   : > { %v230_v19 = vpop.xlane.xlu1 %229 }
 0x163   : > { %447 = vlog2.f32 %v230_v19 }
 0x166   : > { %v252_v20 = vpop.xlane.xlu1 %251 }
 0x167   : > { %v253_v22 = vmul.f32 0.003125, %v252_v20 }
 0x169   : > { %v254_v25 = vadd.f32 0.9, %v253_v22 }
 0x16a   : > { %v243_v21 = vpop.xlane.xlu1 %242 }
 0x16b   : > { %v256_v28 = vmul.f32 0.9, %v243_v21 }
 0x16e   : > { %v249_v26 = vpop.xlane.xlu1 %248 }
 0x16f   : > { %v258_v30 = vmul.f32 0.003125, %v249_v26 }
 0x170   : > { %v448_v23 = vpop.eup %447 }
 0x171   : > { %v232_v24 = vmul.f32 0.6931472, %v448_v23 }
 0x173   : > { %v255_v27 = vmul.f32 %v254_v25, %v232_v24 }
 0x175   : > { %v257_v29 = vsub.f32 %v255_v27, %v256_v28 }
 0x177   : > { %v259_v31 = vsub.f32 %v257_v29, %v258_v30 }
 0x179   : > { %v261_v32 = vsel %vm260_vm2, %v259_v31, 0.0 }
 0x17a   : > { %262 = vadd.xlane.f32.xlu1 %v261_v32 }
 0x203   : > { %v263_v33 = vpop.xlane.xlu1 %262 }
 0x204   : > { %v264_v34 = vrot.slane %v263_v33, 4 }
 0x206   : > { %v265_v35 = vadd.f32 %v264_v34, %v263_v33 }
 0x208   : > { %v266_v36 = vrot.slane %v265_v35, 2 }
 0x20a   : > { %v267_v37 = vadd.f32 %v266_v36, %v265_v35 }
 0x20c   : > { %v268_v38 = vrot.slane %v267_v37, 1 }
 0x20e   : > { %v269_v39 = vadd.f32 %v268_v38, %v267_v37 }
 0x210   : > { %395 = vpush %v269_v39 }
 0x241   : > { %s396_s27 = spop %395 }
 0x242   : > { %v271_v40 = vstv %s396_s27 }
 0x243   : > { %272 = vst [vmem:[%s211_s20] sm:$0xff] %v271_v40 }
 0x244   : > { %490 = shalt.err (!%p487_p2)
}
 0x245   : > { %s491_s8 = scalar_lea.hbm %s285_s5, 128  ;;  %s495_s11 = scalar_lea.hbm %s730_s3, 256 }
 0x246   : > { %p492_p4 = scmp.ne.s32.totalorder %s285_s5, %s491_s8  ;;  %p496_p0 = scmp.lt.s32.totalorder %s285_s5, %s730_s3 }
 0x247   : > { %p497_p6 = scmp.lt.s32.totalorder %s495_s11, %s491_s8 }
 0x248   : > { %p493_p9 = pnand %p492_p4, %p741_p13 }
 0x249   : > { %p498_p11 = por %p497_p6, %p496_p0 }
 0x24a   : > { %p494_p7 = pneg %p493_p9 }
 0x24c   : > { %p499_p12 = pnand %p498_p11, %p494_p7 }
 0x24e   : > { %502 = shalt.err (!%p499_p12)
}
 0x24f   : > { %399 = dma.vmem_to_hbm [thread:$0]  (%p741_p13), %s687_s22, 128, %s285_s5, %s274_s9  }
 0x250 PF: > { %s299_s19 = sand.u32 1, %s529_s12   ;;  %p742_p1 = scmp.ne.s32.totalorder %s736_s25, 0 }
 0x251   : > { %p743_p3 = scmp.ge.s32.totalorder %s541_s15, 2  ;;  %s300_s20 = scalar_lea.sflag [#allocation4], %s299_s19 }
 0x253   : > { %p406_p5 = pnand %p743_p3, %p742_p1 }
 0x255   : > { %p407_p8 = pneg %p406_p5 }
 0x257   : > { %524 = dma.done.wait (%p407_p8), %s300_s20, 128  }
 0x258   : > { %526 = vsyncadd (%p407_p8), %s300_s20, 4294967168  ;;  %p16_p10 = scmp.ge.s32.totalorder %s591_s18, 4   ;;  %s744_s12 = smov %s533_s13 }
 0x259   : > { %s745_s13 = smov %s537_s14  ;;  %s746_s14 = smov %s603_s21 }
 0x25a   : > { %s747_s15 = smov %s591_s18  ;;  %18 = sbr.rel (!%p16_p10) target bundleno = 5 (0x5), region = 83 }
 0x25f   :  { %305 = vsyncpa [#allocation3], 1 }
 0x260   :  { %307 = vsyncpa [#allocation3 + $0x1], 1 }
 0x261   :  { %308 = vsyncpa [#allocation4], 1 }
 0x262   :  { %310 = vsyncpa [#allocation4 + $0x1], 1 }

</bundles_post_ra>
